<compile_context>
chip_gen: v7x
topology: tpu7x:2x2x1
jax: 0.10.0
libtpu: 0.0.40
codegen_flags: <defaults>
</compile_context>

<pallas_src>
import jax
import jax.numpy as jnp
from jax.experimental import pallas as pl
from jax.experimental.pallas import tpu as pltpu


def _focal_loss_kernel(x_ref, t_ref, w_ref, o_ref):
    """One tile: C leading (untiled), H rows on sublanes, W on lanes.

    x_ref: (1, C, t_h, W) logits (native dtype, upcast in-VMEM).
    t_ref: (1, t_h, W)    int32 targets.
    w_ref: (C, 1, 1)      float32 class weights.
    o_ref: (1, t_h, W)    float32 per-pixel loss (lane-dense store).
    """
    x = x_ref[0].astype(jnp.float32)                      # (C, t_h, W)
    t = t_ref[...]                                        # (1, t_h, W) int32
    w = w_ref[...]                                        # (C, 1, 1)

    # Numerically-stable softmax pieces over the class axis (leading axis ->
    # plain VALU adds/maxes across C slices, no XLU).
    m = jnp.max(x, axis=0, keepdims=True)                 # (1, t_h, W)
    z = x - m                                             # (C, t_h, W)
    s = jnp.sum(jnp.exp(z), axis=0, keepdims=True)        # (1, t_h, W)

    # One-hot built once, reused for both gathers.  No full (C,*) logp matrix.
    cls = jax.lax.broadcasted_iota(jnp.int32, z.shape, dimension=0)
    onehot = (cls == t).astype(jnp.float32)               # (C, t_h, W)
    z_t = jnp.sum(onehot * z, axis=0, keepdims=True)      # (1, t_h, W)
    w_t = jnp.sum(onehot * w, axis=0, keepdims=True)      # (1, t_h, W)

    # Focal math only on the gathered per-pixel values.
    logp_t = z_t - jnp.log(s)                             # log_softmax(x)[target]
    p_t = jnp.exp(logp_t)                                 # softmax(x)[target]
    one_minus = 1.0 - p_t
    loss = -w_t * one_minus * one_minus * logp_t          # exponent 2 (as in the module)

    o_ref[...] = loss.astype(o_ref.dtype)


def _pick_h_tile(n, c, h, w):
    """Rows of H per grid step (sublane axis of the tile).

    Sized so one (C, t_h, W) f32 slab is <= ~2 MiB: with double-buffered inputs
    plus a handful of tile-sized temporaries the footprint stays well inside
    v7x's 64 MiB VMEM (and trivially inside v5e/v6e's 128 MiB), while per-step
    DMA stays large enough to amortize the ~0.35 us grid-step overhead.
    """
    slab_budget_f32 = 2 * 1024 * 1024
    rows = slab_budget_f32 // max(1, c * w * 4)
    rows = max(1, min(int(rows), h))
    if rows < h:
        rows = max(8, (rows // 8) * 8)        # sublane-aligned partial tiling
    # v7x megacore: guarantee >= 2 (roughly even) grid steps so both TCs work.
    if n == 1 and pl.cdiv(h, rows) < 2 and h > 8:
        rows = ((h + 1) // 2 + 7) // 8 * 8    # ~half of H, sublane-aligned
        rows = min(rows, h)
    return rows


@jax.jit
def focal_loss(x_nchw, target, weight):
    """x_nchw: (N, C, H, W) float logits (any float dtype); target: (N, H, W) int;
    weight: (C,).  Returns per-pixel focal loss of shape (N, H, W), float32."""
    N, C, H, W = x_nchw.shape

    t = target.astype(jnp.int32)              # (N, H, W) — no relayout of logits
    w = weight.reshape(C, 1, 1).astype(jnp.float32)

    t_h = _pick_h_tile(N, C, H, W)
    n_h = pl.cdiv(H, t_h)                     # partial tail block handled by Pallas

    out = pl.pallas_call(
        _focal_loss_kernel,
        out_shape=jax.ShapeDtypeStruct((N, H, W), jnp.float32),
        grid=(N, n_h),
        in_specs=[
            # Logits: NCHW-native block, C untiled leading, H on sublanes, W on lanes.
            # (If a profile shows exposed DMA for very large C, add
            #  pipeline_mode=pl.Buffered(3) here.)
            pl.BlockSpec((1, C, t_h, W), lambda n, j: (n, 0, j, 0)),
            pl.BlockSpec((1, t_h, W), lambda n, j: (n, j, 0)),      # targets
            pl.BlockSpec((C, 1, 1), lambda n, j: (0, 0, 0)),        # class weights
        ],
        out_specs=pl.BlockSpec((1, t_h, W), lambda n, j: (n, j, 0)),
        compiler_params=pltpu.CompilerParams(
            dimension_semantics=("parallel", "parallel"),  # shards across TCs on v7x
            vmem_limit_bytes=48 * 1024 * 1024,             # > v5e/v6e scoped default, < v7x physical
        ),
    )(x_nchw, t, w)

    return out                                 # already (N, H, W): no output relayout


def _reference(x_nchw, target, weight):
    logp = jax.nn.log_softmax(x_nchw, axis=1)
    p = jax.nn.softmax(x_nchw, axis=1)
    focal = (1.0 - p) ** 2 * logp                                          # (N, C, H, W)
    gathered = jnp.take_along_axis(focal, target[:, None], axis=1)[:, 0]   # (N, H, W)
    return -weight[target] * gathered


if __name__ == "__main__":
    key = jax.random.PRNGKey(0)
    k_x, k_t = jax.random.split(key)

    N, C, H, W = 2, 4, 16, 16
    x = jax.random.normal(k_x, (N, C, H, W), dtype=jnp.float32)
    target = jax.random.randint(k_t, (N, H, W), 0, C, dtype=jnp.int32)
    # Deterministic class weights (FocalLoss.__init__ requires a weight vector).
    weight = jnp.linspace(0.5, 1.5, C, dtype=jnp.float32)

    out = focal_loss(x, target, weight)
    out = jax.block_until_ready(out)

    ref = _reference(x, target, weight)
    assert out.shape == (N, H, W)
    assert jnp.allclose(out, ref, atol=1e-5, rtol=1e-5), "mismatch vs reference"

    print("KERNEL_OK")
</pallas_src>

<mosaic_0001>
module attributes {stable_mosaic.version = 11 : i64} {
  func.func @_focal_loss_kernel(%arg0: i32, %arg1: i32, %arg2: memref<1x4x16x16xf32, #tpu.memory_space<vmem>>, %arg3: memref<1x16x16xi32, #tpu.memory_space<vmem>>, %arg4: memref<4x1x1xf32, #tpu.memory_space<vmem>>, %arg5: memref<1x16x16xf32, #tpu.memory_space<vmem>>) attributes {dimension_semantics = [#tpu.dimension_semantics<parallel>, #tpu.dimension_semantics<parallel>], iteration_bounds = array<i64: 2, 1>, scalar_prefetch = 0 : i64, scratch_operands = 0 : i64, tpu.core_type = #tpu.core_type<tc>, window_params = [{transform_indices = @transform_0, window_bounds = array<i64: 1, 4, 16, 16>}, {transform_indices = @transform_1, window_bounds = array<i64: 1, 16, 16>}, {pipeline_mode = #tpu.pipeline_mode<synchronous>, transform_indices = @transform_2, window_bounds = array<i64: 4, 1, 1>}, {transform_indices = @transform_3, window_bounds = array<i64: 1, 16, 16>}]} {
    %c0 = arith.constant 0 : index
    %c0_0 = arith.constant 0 : index
    %c0_1 = arith.constant 0 : index
    %c0_2 = arith.constant 0 : index
    %0 = vector.load %arg2[%c0, %c0_0, %c0_1, %c0_2] : memref<1x4x16x16xf32, #tpu.memory_space<vmem>>, vector<1x4x16x16xf32>
    %1 = vector.shape_cast %0 : vector<1x4x16x16xf32> to vector<4x16x16xf32>
    %c0_3 = arith.constant 0 : index
    %c0_4 = arith.constant 0 : index
    %c0_5 = arith.constant 0 : index
    %2 = vector.load %arg3[%c0_3, %c0_4, %c0_5] : memref<1x16x16xi32, #tpu.memory_space<vmem>>, vector<1x16x16xi32>
    %c0_6 = arith.constant 0 : index
    %c0_7 = arith.constant 0 : index
    %c0_8 = arith.constant 0 : index
    %3 = vector.load %arg4[%c0_6, %c0_7, %c0_8] : memref<4x1x1xf32, #tpu.memory_space<vmem>>, vector<4x1x1xf32>
    %cst = arith.constant dense<0xFF800000> : vector<16x16xf32>
    %4 = vector.multi_reduction <maximumf>, %1, %cst [0] : vector<4x16x16xf32> to vector<16x16xf32>
    %5 = vector.shape_cast %4 : vector<16x16xf32> to vector<1x16x16xf32>
    %6 = vector.broadcast %5 : vector<1x16x16xf32> to vector<4x16x16xf32>
    %7 = arith.subf %1, %6 : vector<4x16x16xf32>
    %8 = math.exp %7 : vector<4x16x16xf32>
    %cst_9 = arith.constant dense<0.000000e+00> : vector<16x16xf32>
    %9 = vector.multi_reduction <add>, %8, %cst_9 [0] : vector<4x16x16xf32> to vector<16x16xf32>
    %10 = vector.shape_cast %9 : vector<16x16xf32> to vector<1x16x16xf32>
    %11 = tpu.iota {dimensions = array<i32: 0>} : vector<4x16x16xi32>
    %12 = vector.broadcast %2 : vector<1x16x16xi32> to vector<4x16x16xi32>
    %13 = arith.cmpi eq, %11, %12 : vector<4x16x16xi32>
    %14 = arith.extui %13 : vector<4x16x16xi1> to vector<4x16x16xi32>
    %15 = arith.sitofp %14 : vector<4x16x16xi32> to vector<4x16x16xf32>
    %16 = arith.mulf %15, %7 : vector<4x16x16xf32>
    %cst_10 = arith.constant dense<0.000000e+00> : vector<16x16xf32>
    %17 = vector.multi_reduction <add>, %16, %cst_10 [0] : vector<4x16x16xf32> to vector<16x16xf32>
    %18 = vector.shape_cast %17 : vector<16x16xf32> to vector<1x16x16xf32>
    %19 = vector.broadcast %3 : vector<4x1x1xf32> to vector<4x16x16xf32>
    %20 = arith.mulf %15, %19 : vector<4x16x16xf32>
    %cst_11 = arith.constant dense<0.000000e+00> : vector<16x16xf32>
    %21 = vector.multi_reduction <add>, %20, %cst_11 [0] : vector<4x16x16xf32> to vector<16x16xf32>
    %22 = vector.shape_cast %21 : vector<16x16xf32> to vector<1x16x16xf32>
    %23 = math.log %10 : vector<1x16x16xf32>
    %24 = arith.subf %18, %23 : vector<1x16x16xf32>
    %25 = math.exp %24 : vector<1x16x16xf32>
    %cst_12 = arith.constant 1.000000e+00 : f32
    %26 = vector.broadcast %cst_12 : f32 to vector<1x16x16xf32>
    %27 = arith.subf %26, %25 : vector<1x16x16xf32>
    %cst_13 = arith.constant 0.000000e+00 : f32
    %28 = vector.broadcast %cst_13 : f32 to vector<1x16x16xf32>
    %29 = arith.subf %28, %22 : vector<1x16x16xf32>
    %30 = arith.mulf %29, %27 : vector<1x16x16xf32>
    %31 = arith.mulf %30, %27 : vector<1x16x16xf32>
    %32 = arith.mulf %31, %24 : vector<1x16x16xf32>
    %c0_14 = arith.constant 0 : index
    %c0_15 = arith.constant 0 : index
    %c0_16 = arith.constant 0 : index
    %33 = vector.load %arg5[%c0_14, %c0_15, %c0_16] : memref<1x16x16xf32, #tpu.memory_space<vmem>>, vector<1x16x16xf32>
    tpu.vector_store %arg5[%c0_14, %c0_15, %c0_16], %32 {strides = array<i32>} : memref<1x16x16xf32, #tpu.memory_space<vmem>>, vector<1x16x16xf32>,
    return
  }
  func.func @transform_0(%arg0: i32, %arg1: i32) -> (i32, i32, i32, i32) {
    %c0_i32 = arith.constant 0 : i32
    %c0_i32_0 = arith.constant 0 : i32
    %c0_i32_1 = arith.constant 0 : i32
    return %arg0, %c0_i32, %arg1, %c0_i32_0 : i32, i32, i32, i32
  }
  func.func @transform_1(%arg0: i32, %arg1: i32) -> (i32, i32, i32) {
    %c0_i32 = arith.constant 0 : i32
    %c0_i32_0 = arith.constant 0 : i32
    return %arg0, %arg1, %c0_i32 : i32, i32, i32
  }
  func.func @transform_2(%arg0: i32, %arg1: i32) -> (i32, i32, i32) {
    %c0_i32 = arith.constant 0 : i32
    %c0_i32_0 = arith.constant 0 : i32
    %c0_i32_1 = arith.constant 0 : i32
    %c0_i32_2 = arith.constant 0 : i32
    return %c0_i32, %c0_i32_0, %c0_i32_1 : i32, i32, i32
  }
  func.func @transform_3(%arg0: i32, %arg1: i32) -> (i32, i32, i32) {
    %c0_i32 = arith.constant 0 : i32
    %c0_i32_0 = arith.constant 0 : i32
    return %arg0, %arg1, %c0_i32 : i32, i32, i32
  }
}

</mosaic_0001>

<bundles_post_ra>
// kernel: focal_loss.1
= control target key start
LH: loop header
LB: loop body
LE: loop exit
PB: predicated region body
PF: predicated region fallthrough
CT: control target
= control target key end

     0   :  { %8 = vsyncpa [#allocation3], 0  ;;  %s1187_s0 = inlined_call_operand.hbm [shape: f32[2,4,16,16], index: 0, kind: input, shape index: {}]   ;;  %s1188_s1 = inlined_call_operand.hbm [shape: s32[2,16,16], index: 1, kind: input, shape index: {}]   ;;  %s1189_s2 = inlined_call_operand.vmem [shape: f32[4,1,1], index: 2, kind: input, shape index: {}]   ;;  %s1190_s3 = inlined_call_operand.hbm [shape: f32[2,16,16], index: 3, kind: output, shape index: {}]  }
   0x1   :  { %10 = vsyncpa [#allocation3 + $0x1], 0 }
   0x2   :  { %11 = vsyncpa [#allocation6], 0 }
   0x3   :  { %13 = vsyncpa [#allocation6 + $0x1], 0 }
   0x4   :  { %14 = vsyncpa [#allocation4], 0 }
   0x5   :  { %16 = vsyncpa [#allocation4 + $0x1], 0  ;;  %s886_s12 = smov 0   ;;  %s888_s13 = smov 0  }
   0x6   :  { %s890_s14 = smov 0   ;;  %s892_s15 = smov 0  }
   0x7   :  { %s894_s16 = smov 0   ;;  %s896_s17 = smov 0  }
   0x8 LB: > { %s576_s18 = sadd.s32 4294967295, %s855_s17   ;;  %s577_s19 = sadd.s32 4294967294, %s855_s17   ;;  %s855_s17 = sphi %s896_s17, %s22_s17   ;;  %s851_s16 = sphi %s894_s16, %s1208_s16   ;;  %s847_s15 = sphi %s892_s15, %s1207_s15   ;;  %s843_s14 = sphi %s890_s14, %s1206_s14   ;;  %s839_s13 = sphi %s888_s13, %s1205_s13   ;;  %s835_s12 = sphi %s886_s12, %s1204_s12  }
   0x9   : > { %s34_s20 = sadd.s32 1, %s851_s16  ;;  %s43_s21 = sadd.s32 1, %s843_s14 }
   0xa   : > { %p36_p0 = scmp.ge.s32.totalorder %s34_s20, 2  ;;  %p50_p1 = scmp.ne.s32.totalorder %s843_s14, %s839_s13 }
   0xb   : > { %p51_p2 = scmp.eq.s32.totalorder %s855_s17, 0  ;;  %p56_p3 = scmp.ne.s32.totalorder %s839_s13, %s835_s12 }
   0xc   : > { %s1210_s20 = smov (%p36_p0, %s34_s20), 0  ;;  %p57_p5 = scmp.eq.s32.totalorder %s576_s18, 0 }
   0xd   : > { %p927_p4 = por %p51_p2, %p50_p1  ;;  %s38_s23 = ssub.s32 %s851_s16, %s1210_s20 }
   0xe   : > { %p131_p6 = scmp.eq.s32.totalorder %s576_s18, 1  ;;  %p41_p7 = scmp.eq.s32.totalorder %s38_s23, 0 }
   0xf   : > { %p933_p8 = por %p57_p5, %p56_p3  ;;  %p137_p10 = scmp.eq.s32.totalorder %s577_s19, 1 }
  0x10   : > { %p937_p9 = por %p131_p6, %p50_p1  ;;  %p627_p13 = scmp.lt.s32.totalorder %s855_s17, 2 }
  0x11   : > { %s1194_s24 = scalar_select %p933_p8, 1, 0 }
  0x12   : > { %s1195_s25 = scalar_select %p937_p9, 1, 0 }
  0x13   : > { %s942_s26 = scalar_select %p41_p7, %s843_s14, %s43_s21  }
  0x14   : > { %p944_p11 = por %p137_p10, %p56_p3  ;;  %s951_s28 = sand.u32 1, %s843_s14  }
  0x15   : > { %s580_s29 = sshll.u32 %s951_s28, 6  ;;  %s607_s30 = sshll.u32 %s851_s16, 10 }
  0x16   : > { %s1196_s27 = scalar_select %p944_p11, 1, 0 }
  0x17   : > { %s958_s6 = scalar_lea.hbm %s1187_s0, %s607_s30  ;;  %s164_s7 = scalar_lea.vmem [#allocation2], %s580_s29 }
  0x18   : > { %s173_s8 = sshll.u32 %s164_s7, 4  ;;  %p964_p0 = pnand %p627_p13, %p927_p4  ;;  %s960_s8 = int_to_ptr.vmem [resolvable:$true] %s173_s8 }
  0x19   : > { %s161_s10 = scalar_lea.sflag [#allocation3], %s951_s28  ;;  %s709_s11 = scalar_lea.hbm %s958_s6, 1024 }
  0x1a   : > { %p710_p2 = scmp.ne.s32.totalorder %s958_s6, %s709_s11  ;;  %p711_p3 = pneg %p964_p0 }
  0x1b   : > { %s714_s21 = scalar_lea.hbm %s1187_s0, 2048  ;;  %p715_p4 = scmp.lt.u32.totalorder %s958_s6, %s1187_s0 }
  0x1c   : > { %p712_p5 = pnand %p711_p3, %p710_p2  ;;  %p716_p7 = scmp.lt.u32.totalorder %s714_s21, %s709_s11 }
  0x1d   : > { %p718_p13 = scmp.lt.u32.totalorder %s709_s11, %s958_s6 }
  0x1e   : > { %p713_p6 = pneg %p712_p5  ;;  %p717_p10 = por %p716_p7, %p715_p4 }
  0x20   : > { %p719_p12 = por %p718_p13, %p717_p10 }
  0x22   : > { %p720_p1 = pnand %p719_p12, %p713_p6 }
  0x24   : > { %723 = shalt.err (!%p720_p1)
}
  0x25   : > { %s724_s29 = scalar_lea.vmem %s960_s8, 1024  ;;  %s857_s30 = smov [#allocation2]  }
  0x26   : > { %p725_p2 = scmp.ne.s32.totalorder %s960_s8, %s724_s29  ;;  %s729_s4 = sshll.u32 %s857_s30, 4  ;;  %s730_s4 = int_to_ptr.vmem [resolvable:$false] %s729_s4 }
  0x27   : > { %s731_s5 = scalar_lea.vmem %s730_s4, 2048  ;;  %p732_p9 = scmp.lt.s32.totalorder %s960_s8, %s730_s4 }
  0x28   : > { %p727_p5 = pnand %p725_p2, %p711_p3  ;;  %p733_p4 = scmp.lt.s32.totalorder %s731_s5, %s724_s29 }
  0x2a   : > { %p728_p11 = pneg %p727_p5  ;;  %p734_p7 = por %p733_p4, %p732_p9 }
  0x2c   : > { %p735_p10 = pnand %p734_p7, %p728_p11 }
  0x2e   : > { %738 = shalt.err (!%p735_p10)
}
  0x2f   : > { %s858_s7 = smov 128   ;;  %s859_s11 = smov 8  }
  0x30   : > { %619 = dma.hbm_to_vmem [thread:$0]  (!%p964_p0), %s958_s6, 1024, %s960_s8, %s161_s10, %s858_s7, %s858_s7, %s859_s11  }
  0x31   : > { %p204_p9 = scmp.lt.s32.totalorder %s855_s17, 3  ;;  %s583_s18 = sshll.u32 %s951_s28, 4 }
  0x32   : > { %s608_s19 = sshll.u32 %s851_s16, 8  ;;  %p1198_p11 = scmp.ge.s32.totalorder %s855_s17, 1 }
  0x33   : > { %s1012_s29 = scalar_lea.hbm %s1188_s1, %s608_s19  ;;  %s187_s30 = scalar_lea.vmem [#allocation5], %s583_s18 }
  0x34   : > { %p1005_p12 = pnand %p1198_p11, %p204_p9  ;;  %s196_s4 = sshll.u32 %s187_s30, 4  ;;  %s1014_s4 = int_to_ptr.vmem [resolvable:$true] %s196_s4 }
  0x35   : > { %s184_s6 = scalar_lea.sflag [#allocation6], %s951_s28  ;;  %s739_s8 = scalar_lea.hbm %s1012_s29, 256 }
  0x36   : > { %p740_p1 = scmp.ne.s32.totalorder %s1012_s29, %s739_s8  ;;  %s744_s19 = scalar_lea.hbm %s1188_s1, 512 }
  0x37   : > { %p745_p2 = scmp.lt.u32.totalorder %s1012_s29, %s1188_s1  ;;  %p746_p5 = scmp.lt.u32.totalorder %s744_s19, %s739_s8 }
  0x38   : > { %p742_p6 = pnand %p740_p1, %p711_p3  ;;  %p748_p7 = scmp.lt.u32.totalorder %s739_s8, %s1012_s29 }
  0x39   : > { %p747_p4 = por %p746_p5, %p745_p2 }
  0x3a   : > { %p743_p13 = pneg %p742_p6 }
  0x3b   : > { %p749_p10 = por %p748_p7, %p747_p4 }
  0x3d   : > { %p750_p9 = pnand %p749_p10, %p743_p13 }
  0x3f   : > { %753 = shalt.err (!%p750_p9)
}
  0x40   : > { %s754_s18 = scalar_lea.vmem %s1014_s4, 256  ;;  %s860_s30 = smov [#allocation5]  }
  0x41   : > { %p755_p11 = scmp.ne.s32.totalorder %s1014_s4, %s754_s18  ;;  %s759_s10 = sshll.u32 %s860_s30, 4  ;;  %s760_s10 = int_to_ptr.vmem [resolvable:$false] %s759_s10 }
  0x42   : > { %s761_s5 = scalar_lea.vmem %s760_s10, 512  ;;  %p762_p8 = scmp.lt.s32.totalorder %s1014_s4, %s760_s10 }
  0x43   : > { %p757_p1 = pnand %p755_p11, %p711_p3  ;;  %p763_p2 = scmp.lt.s32.totalorder %s761_s5, %s754_s18 }
  0x45   : > { %p758_p6 = pneg %p757_p1  ;;  %p764_p5 = por %p763_p2, %p762_p8 }
  0x47   : > { %p765_p4 = pnand %p764_p5, %p758_p6 }
  0x49   : > { %768 = shalt.err (!%p765_p4)
}
  0x4a   : > { %622 = dma.hbm_to_vmem [thread:$0]  (!%p964_p0), %s1012_s29, 256, %s1014_s4, %s184_s6, %s858_s7, %s858_s7, %s859_s11  }
  0x4b   : > { %208 = sbr.rel (%p1005_p12) target bundleno = 252 (0xfc), region = 32  ;;  %s1048_s8 = sand.u32 (!%p1005_p12), 1, %s839_s13  }
  0x4c   : > { %s587_s19 = sshll.u32 (!%p1005_p12), %s1048_s8, 6  ;;  %s211_s22 = scalar_lea.sflag (!%p1005_p12), [#allocation3], %s1048_s8 }
  0x4d   : > { %s214_s9 = scalar_lea.vmem (!%p1005_p12), [#allocation2], %s587_s19  ;;  %p1200_p8 = scmp.ne.s32.totalorder (!%p1005_p12), %s1194_s24, 0 }
  0x52   : > { %822 = dma.done.wait (%p1200_p8), %s211_s22, 1024  }
  0x53   : > { %824 = vsyncadd (%p1200_p8), %s211_s22, 4294966272  ;;  %s588_s28 = sshll.u32 %s1048_s8, 4  ;;  %s220_s7 = scalar_lea.sflag [#allocation6], %s1048_s8 }
  0x54   : > { %s1060_s11 = scalar_lea.vmem [#allocation5], %s588_s28 }
  0x55   : > { %826 = dma.done.wait (%p1200_p8), %s220_s7, 256  }
  0x56   : > { %828 = vsyncadd (%p1200_p8), %s220_s7, 4294967040  ;;  %v861_v0 = vmov 0   ;;  %v600_v1 = vld [vmem:[%s1189_s2 + $0x2] ss:$0 sm:$0xff]  ;;  %v598_v2 = vld [vmem:[%s1189_s2] ss:$0 sm:$0xff] }
  0x57   : > { %684 = vset.pattern.permute.xlu1 %v861_v0  ;;  %683 = vset.pattern.permute.xlu0 %v861_v0  ;;  %v601_v3 = vld [vmem:[%s1189_s2 + $0x3] ss:$0 sm:$0xff]  ;;  %v599_v4 = vld [vmem:[%s1189_s2 + $0x1] ss:$0 sm:$0xff]  ;;  %v255_v6 = vld [vmem:[%s214_s9 + $0x8] sm:$0xff]  ;;  %vm268_vm0 = vcmask 130048  }
  0x58   : > { %396 = vperm.xlu1 %684, %v600_v1   ;;  %388 = vperm.xlu0 %683, %v598_v2   ;;  %v254_v5 = vld [vmem:[%s214_s9] sm:$0xff]  ;;  %v256_v7 = vld [vmem:[%s214_s9 + $0x10] sm:$0xff]  ;;  %v257_v10 = vld [vmem:[%s214_s9 + $0x18] sm:$0xff]  ;;  %v276_v17 = vsel %vm268_vm0, %v255_v6, -inf  ;;  %v862_v1 = vmov 0.0   ;;  %s609_s10 = sshll.u32 %s847_s15, 8 }
  0x59   : > { %v258_v8 = vld [vmem:[%s214_s9 + $0x20] sm:$0xff]  ;;  %v260_v9 = vld [vmem:[%s214_s9 + $0x30] sm:$0xff]  ;;  %v259_v11 = vld [vmem:[%s214_s9 + $0x28] sm:$0xff]  ;;  %v269_v13 = vsel %vm268_vm0, %v254_v5, -inf  ;;  %v270_v14 = vsel %vm268_vm0, %v256_v7, -inf  ;;  %v277_v18 = vsel %vm268_vm0, %v257_v10, -inf  ;;  %s1134_s7 = scalar_lea.hbm %s1190_s3, %s609_s10 }
  0x5a   : > { %v261_v12 = vld [vmem:[%s214_s9 + $0x38] sm:$0xff]  ;;  %v271_v15 = vsel %vm268_vm0, %v258_v8, -inf  ;;  %v273_v16 = vsel %vm268_vm0, %v260_v9, -inf  ;;  %v278_v19 = vsel %vm268_vm0, %v259_v11, -inf  ;;  %v262_v54 = vld [vmem:[%s1060_s11] sm:$0xff]  ;;  %s250_s5 = scalar_lea.vmem [#allocation7], %s588_s28 }
  0x5b   : > { %v280_v20 = vsel %vm268_vm0, %v261_v12, -inf  ;;  %v272_v21 = vmax.f32 %v269_v13, %v271_v15  ;;  %v274_v22 = vmax.f32 %v270_v14, %v273_v16  ;;  %v279_v23 = vmax.f32 %v276_v17, %v278_v19  ;;  %v263_v58 = vld [vmem:[%s1060_s11 + $0x8] sm:$0xff]  ;;  %s463_s19 = sshll.u32 %s250_s5, 4  ;;  %s448_s15 = scalar_lea.sflag [#allocation4], %s1048_s8  ;;  %s1136_s19 = int_to_ptr.vmem [resolvable:$true] %s463_s19 }
  0x5c   : > { %400 = vperm.xlu1 %684, %v601_v3   ;;  %392 = vperm.xlu0 %683, %v599_v4   ;;  %v281_v24 = vmax.f32 %v277_v18, %v280_v20  ;;  %vm321_vm1 = vcmp.eq.s32.totalorder %v262_v54, 0  ;;  %vm323_vm2 = vcmp.eq.s32.totalorder %v262_v54, 1  ;;  %vm322_vm3 = vcmp.eq.s32.totalorder %v263_v58, 0  ;;  %s769_s28 = scalar_lea.vmem %s1136_s19, 256  ;;  %p1201_p3 = scmp.ne.s32.totalorder %s1195_s25, 0 }
  0x5d   : > { %v275_v25 = vmax.f32 %v272_v21, %v274_v22  ;;  %vm324_vm4 = vcmp.eq.s32.totalorder %v263_v58, 1  ;;  %v590_v2 = vsel %vm321_vm1, 1.0, %v862_v1  ;;  %v592_v3 = vsel %vm323_vm2, 1.0, %v862_v1  ;;  %p770_p0 = scmp.ne.s32.totalorder %s1136_s19, %s769_s28  ;;  %s863_s11 = smov [#allocation7]  }
  0x5e   : > { %v282_v26 = vmax.f32 %v279_v23, %v281_v24  ;;  %vm325_vm5 = vcmp.eq.s32.totalorder %v262_v54, 2  ;;  %v591_v4 = vsel %vm322_vm3, 1.0, %v862_v1  ;;  %vm326_vm6 = vcmp.eq.s32.totalorder %v263_v58, 2  ;;  %s773_s21 = sshll.u32 %s863_s11, 4  ;;  %s774_s21 = int_to_ptr.vmem [resolvable:$false] %s773_s21 }
  0x5f   : > { %v283_v27 = vsub.f32 %v254_v5, %v275_v25  ;;  %v285_v29 = vsub.f32 %v256_v7, %v275_v25  ;;  %v1086_v33 = vsub.f32 %v258_v8, %v275_v25  ;;  %v1091_v38 = vsub.f32 %v260_v9, %v275_v25  ;;  %p771_p12 = pnand %p770_p0, %p1201_p3  ;;  %s775_s29 = scalar_lea.vmem %s774_s21, 512 }
  0x60   : > { %v284_v28 = vsub.f32 %v255_v6, %v282_v26  ;;  %v286_v30 = vsub.f32 %v257_v10, %v282_v26  ;;  %v1088_v35 = vsub.f32 %v259_v11, %v282_v26  ;;  %v1094_v40 = vsub.f32 %v261_v12, %v282_v26  ;;  %p776_p7 = scmp.lt.s32.totalorder %s1136_s19, %s774_s21  ;;  %p777_p10 = scmp.lt.s32.totalorder %s775_s29, %s769_s28 }
  0x61   : > { %v291_v31 = vmul.f32 1.442695, %v283_v27  ;;  %v295_v34 = vmul.f32 1.442695, %v285_v29  ;;  %v299_v37 = vmul.f32 1.442695, %v1086_v33  ;;  %v345_v8 = vmul.f32 %v590_v2, %v283_v27  ;;  %p772_p13 = pneg %p771_p12 }
  0x62   : > { %v293_v32 = vmul.f32 1.442695, %v284_v28  ;;  %v297_v36 = vmul.f32 1.442695, %v286_v30  ;;  %v301_v39 = vmul.f32 1.442695, %v1088_v35  ;;  %v347_v9 = vmul.f32 %v592_v3, %v285_v29  ;;  %p778_p9 = por %p777_p10, %p776_p7 }
  0x63   : > { %685 = vpow2.f32 %v291_v31  ;;  %v303_v41 = vmul.f32 1.442695, %v1091_v38  ;;  %v305_v42 = vmul.f32 1.442695, %v1094_v40  ;;  %v593_v6 = vsel %vm324_vm4, 1.0, %v862_v1 }
  0x64   : > { %687 = vpow2.f32 %v293_v32  ;;  %v594_v10 = vsel %vm325_vm5, 1.0, %v862_v1  ;;  %v346_v11 = vmul.f32 %v591_v4, %v284_v28  ;;  %v348_v12 = vmul.f32 %v593_v6, %v286_v30  ;;  %p779_p11 = pnand %p778_p9, %p772_p13 }
  0x65   : > { %689 = vpow2.f32 %v295_v34  ;;  %v595_v13 = vsel %vm326_vm6, 1.0, %v862_v1  ;;  %vm327_vm7 = vcmp.eq.s32.totalorder %v262_v54, 3  ;;  %vm328_vm8 = vcmp.eq.s32.totalorder %v263_v58, 3 }
  0x66   : > { %691 = vpow2.f32 %v297_v36  ;;  %v349_v14 = vmul.f32 %v594_v10, %v1086_v33  ;;  %v353_v15 = vsel %vm268_vm0, %v345_v8, 0.0  ;;  %v354_v16 = vsel %vm268_vm0, %v347_v9, 0.0 }
  0x67   : > { %693 = vpow2.f32 %v299_v37  ;;  %v350_v17 = vmul.f32 %v595_v13, %v1088_v35  ;;  %v360_v18 = vsel %vm268_vm0, %v346_v11, 0.0  ;;  %v596_v19 = vsel %vm327_vm7, 1.0, %v862_v1 }
  0x68   : > { %695 = vpow2.f32 %v301_v39  ;;  %v361_v20 = vsel %vm268_vm0, %v348_v12, 0.0  ;;  %v597_v21 = vsel %vm328_vm8, 1.0, %v862_v1  ;;  %v355_v22 = vadd.f32 %v354_v16, %v353_v15 }
  0x69   : > { %697 = vpow2.f32 %v303_v41  ;;  %v356_v23 = vsel %vm268_vm0, %v349_v14, 0.0  ;;  %v351_v24 = vmul.f32 %v596_v19, %v1091_v38  ;;  %v362_v25 = vadd.f32 %v361_v20, %v360_v18 }
  0x6a   : > { %699 = vpow2.f32 %v305_v42  ;;  %v363_v26 = vsel %vm268_vm0, %v350_v17, 0.0  ;;  %v352_v27 = vmul.f32 %v597_v21, %v1094_v40  ;;  %v357_v28 = vadd.f32 %v356_v23, %v355_v22 }
  0x6b   : > { %v358_v30 = vsel %vm268_vm0, %v351_v24, 0.0  ;;  %v364_v31 = vadd.f32 %v363_v26, %v362_v25 }
  0x6c   : > { %v365_v33 = vsel %vm268_vm0, %v352_v27, 0.0  ;;  %v359_v34 = vadd.f32 %v358_v30, %v357_v28 }
  0x6d   : > { %v686_v43 = vpop.eup %685  ;;  %v366_v36 = vadd.f32 %v365_v33, %v364_v31 }
  0x6e   : > { %v688_v44 = vpop.eup %687  ;;  %v307_v47 = vsel %vm268_vm0, %v686_v43, 0.0 }
  0x6f   : > { %v690_v45 = vpop.eup %689  ;;  %v314_v50 = vsel %vm268_vm0, %v688_v44, 0.0 }
  0x70   : > { %v692_v46 = vpop.eup %691  ;;  %v308_v48 = vsel %vm268_vm0, %v690_v45, 0.0 }
  0x71   : > { %v694_v49 = vpop.eup %693  ;;  %v315_v51 = vsel %vm268_vm0, %v692_v46, 0.0  ;;  %v309_v53 = vadd.f32 %v308_v48, %v307_v47 }
  0x72   : > { %v696_v52 = vpop.eup %695  ;;  %v310_v55 = vsel %vm268_vm0, %v694_v49, 0.0  ;;  %v316_v56 = vadd.f32 %v315_v51, %v314_v50 }
  0x73   : > { %v698_v57 = vpop.eup %697  ;;  %v317_v59 = vsel %vm268_vm0, %v696_v52, 0.0  ;;  %v311_v61 = vadd.f32 %v310_v55, %v309_v53 }
  0x74   : > { %v700_v60 = vpop.eup %699  ;;  %v312_v62 = vsel %vm268_vm0, %v698_v57, 0.0  ;;  %v318_v63 = vadd.f32 %v317_v59, %v316_v56 }
  0x75   : > { %v319_v0 = vsel %vm268_vm0, %v700_v60, 0.0  ;;  %v313_v5 = vadd.f32 %v312_v62, %v311_v61 }
  0x76   : > { %v320_v7 = vadd.f32 %v319_v0, %v318_v63 }
  0x77   : > { %701 = vlog2.f32 %v313_v5 }
  0x78   : > { %703 = vlog2.f32 %v320_v7 }
  0x81   : > { %v702_v29 = vpop.eup %701 }
  0x82   : > { %v704_v32 = vpop.eup %703  ;;  %v426_v35 = vmul.f32 0.6931472, %v702_v29 }
  0x83   : > { %v428_v37 = vmul.f32 0.6931472, %v704_v32 }
  0x84   : > { %v429_v39 = vsub.f32 %v359_v34, %v426_v35 }
  0x85   : > { %v430_v41 = vsub.f32 %v366_v36, %v428_v37 }
  0x86   : > { %v431_v38 = vmul.f32 1.442695, %v429_v39 }
  0x87   : > { %v433_v42 = vmul.f32 1.442695, %v430_v41 }
  0x88   : > { %705 = vpow2.f32 %v431_v38 }
  0x89   : > { %707 = vpow2.f32 %v433_v42 }
  0x92   : > { %v706_v58 = vpop.eup %705 }
  0x93   : > { %v708_v61 = vpop.eup %707 }
  0x94   : > { %v436_v7 = vsub.f32 1.0, %v708_v61 }
  0xd7   : > { %v397_v43 = vpop.permute.xlu1 %396  ;;  %v389_v40 = vpop.permute.xlu0 %388 }
  0xd8   : > { %v403_v44 = vmul.f32 %v590_v2, %v389_v40  ;;  %v404_v45 = vmul.f32 %v591_v4, %v389_v40  ;;  %v407_v48 = vmul.f32 %v594_v10, %v397_v43  ;;  %v408_v49 = vmul.f32 %v595_v13, %v397_v43 }
  0xda   : > { %v411_v52 = vsel %vm268_vm0, %v403_v44, 0.0  ;;  %v418_v53 = vsel %vm268_vm0, %v404_v45, 0.0  ;;  %v414_v62 = vsel %vm268_vm0, %v407_v48, 0.0  ;;  %v421_v63 = vsel %vm268_vm0, %v408_v49, 0.0 }
  0xdb   : > { %v401_v46 = vpop.permute.xlu1 %400  ;;  %v393_v47 = vpop.permute.xlu0 %392 }
  0xdc   : > { %v405_v50 = vmul.f32 %v592_v3, %v393_v47  ;;  %v406_v51 = vmul.f32 %v593_v6, %v393_v47  ;;  %v409_v54 = vmul.f32 %v596_v19, %v401_v46  ;;  %v410_v55 = vmul.f32 %v597_v21, %v401_v46 }
  0xdd   : > { %v435_v6 = vsub.f32 1.0, %v706_v58 }
  0xde   : > { %v412_v56 = vsel %vm268_vm0, %v405_v50, 0.0  ;;  %v419_v57 = vsel %vm268_vm0, %v406_v51, 0.0  ;;  %v416_v2 = vsel %vm268_vm0, %v409_v54, 0.0  ;;  %v423_v3 = vsel %vm268_vm0, %v410_v55, 0.0 }
  0xdf   : > { %v413_v59 = vadd.f32 %v412_v56, %v411_v52  ;;  %v420_v60 = vadd.f32 %v419_v57, %v418_v53 }
  0xe1   : > { %v415_v0 = vadd.f32 %v414_v62, %v413_v59  ;;  %v422_v1 = vadd.f32 %v421_v63, %v420_v60 }
  0xe3   : > { %v417_v4 = vadd.f32 %v416_v2, %v415_v0  ;;  %v424_v5 = vadd.f32 %v423_v3, %v422_v1 }
  0xe5   : > { %v437_v8 = vsub.f32 0.0, %v417_v4  ;;  %v438_v9 = vsub.f32 0.0, %v424_v5 }
  0xe7   : > { %v439_v10 = vmul.f32 %v437_v8, %v435_v6  ;;  %v440_v11 = vmul.f32 %v438_v9, %v436_v7 }
  0xe9   : > { %v441_v12 = vmul.f32 %v439_v10, %v435_v6  ;;  %v442_v13 = vmul.f32 %v440_v11, %v436_v7 }
  0xeb   : > { %v443_v14 = vmul.f32 %v441_v12, %v429_v39  ;;  %v444_v15 = vmul.f32 %v442_v13, %v430_v41 }
  0xed   : > { %445 = vst.msk [vmem:[%s250_s5] sm:$0xff] %vm268_vm0, %v443_v14  ;;  %446 = vst.msk [vmem:[%s250_s5 + $0x8] sm:$0xff] %vm268_vm0, %v444_v15 }
  0xee   : > { %782 = shalt.err (!%p779_p11)
}
  0xef   : > { %s783_s4 = scalar_lea.hbm %s1134_s7, 256  ;;  %s787_s18 = scalar_lea.hbm %s1190_s3, 512 }
  0xf0   : > { %p784_p1 = scmp.ne.s32.totalorder %s1134_s7, %s783_s4  ;;  %p788_p5 = scmp.lt.u32.totalorder %s1134_s7, %s1190_s3 }
  0xf1   : > { %p789_p4 = scmp.lt.u32.totalorder %s787_s18, %s783_s4  ;;  %p791_p0 = scmp.lt.u32.totalorder %s783_s4, %s1134_s7 }
  0xf2   : > { %p785_p6 = pnand %p784_p1, %p1201_p3 }
  0xf3   : > { %p790_p8 = por %p789_p4, %p788_p5 }
  0xf4   : > { %p786_p2 = pneg %p785_p6 }
  0xf5   : > { %p792_p12 = por %p791_p0, %p790_p8 }
  0xf7   : > { %p793_p13 = pnand %p792_p12, %p786_p2 }
  0xf9   : > { %796 = shalt.err (!%p793_p13)
}
  0xfa   : > { %s864_s10 = smov 128   ;;  %s865_s5 = smov 8  }
  0xfb   : > { %614 = dma.vmem_to_hbm [thread:$0]  (%p1201_p3), %s1136_s19, 256, %s1134_s7, %s448_s15, %s864_s10, %s864_s10, %s865_s5  }
  0xfc PF: > { %s478_s22 = sand.u32 1, %s835_s12   ;;  %p1202_p7 = scmp.ne.s32.totalorder %s1196_s27, 0 }
  0xfd   : > { %p1203_p10 = scmp.ge.s32.totalorder %s855_s17, 2  ;;  %s479_s9 = scalar_lea.sflag [#allocation4], %s478_s22 }
  0xff   : > { %p624_p9 = pnand %p1203_p10, %p1202_p7 }
 0x101   : > { %830 = dma.done.wait (!%p624_p9), %s479_s9, 256  }
 0x102   : > { %832 = vsyncadd (!%p624_p9), %s479_s9, 4294967040  ;;  %s22_s17 = sadd.s32 1, %s855_s17   ;;  %s1204_s12 = smov %s839_s13 }
 0x103   : > { %p19_p11 = scmp.ge.s32.totalorder %s22_s17, 4   ;;  %s1205_s13 = smov %s843_s14 }
 0x104   : > { %s1206_s14 = smov %s942_s26  ;;  %s1207_s15 = smov %s851_s16 }
 0x105   : > { %s1208_s16 = smov %s1210_s20  ;;  %21 = sbr.rel (!%p19_p11) target bundleno = 8 (0x8), region = 90 }
 0x10c   :  { %484 = vsyncpa [#allocation3], 1 }
 0x10d   :  { %486 = vsyncpa [#allocation3 + $0x1], 1 }
 0x10e   :  { %487 = vsyncpa [#allocation6], 1 }
 0x10f   :  { %489 = vsyncpa [#allocation6 + $0x1], 1 }
 0x110   :  { %490 = vsyncpa [#allocation4], 1 }
 0x111   :  { %492 = vsyncpa [#allocation4 + $0x1], 1 }

</bundles_post_ra>
